<compile_context>
chip_gen: v5e
topology: v5e:2x2
jax: 0.10.0
libtpu: 0.0.40
codegen_flags: <defaults>
</compile_context>

<pallas_src>
import functools
import math

import jax
import jax.numpy as jnp
from jax.experimental import pallas as pl
from jax.experimental.pallas import tpu as pltpu

_LANES = 128
_TARGET_TILE_BYTES = 4 * 1024 * 1024    # ~4 MiB tiles -> halves per-step overhead
_VMEM_LIMIT_BYTES = 48 * 1024 * 1024    # > v5e/v6e scoped defaults, < v7x 64 MiB
_MIN_GRID_STEPS = 4                     # give v7x's 2 TCs >= 2 grid steps each
_MAX_PACK_LANES = 512                   # cap lcm(d,128) so MXU stays hidden by DMA


def _round_up(v, m):
    return -(-v // m) * m


# ----------------------------- kernels --------------------------------------

def _layernorm_rows_kernel(wb_ref, x_ref, o_ref, *, eps):
    # wb_ref: SMEM (2,) = [w, b];  x_ref / o_ref: VMEM (block_rows, d)
    x = x_ref[...].astype(jnp.float32)
    mu = jnp.mean(x, axis=-1, keepdims=True)
    xc = x - mu
    var = jnp.mean(xc * xc, axis=-1, keepdims=True)      # centered: no cancellation
    scale = wb_ref[0] * jax.lax.rsqrt(var + eps)         # EUP rsqrt, folded gain
    o_ref[...] = (xc * scale + wb_ref[1]).astype(o_ref.dtype)


def _layernorm_packed_kernel(wb_ref, x_ref, o_ref, *, d, p, eps):
    # x_ref / o_ref: VMEM (block_rows, p) holding g = p // d logical rows per
    # p-lane super-row (lane-dense loads/stores).  Segmented mean/variance via
    # (block_rows, p) @ (p, p) block-diagonal 0/1 matrix on the otherwise-idle
    # MXU; bf16 hi/lo split keeps the sums ~f32-accurate (~1e-5).
    x = x_ref[...].astype(jnp.float32)

    # Block-diagonal mask built in-kernel (no HBM input / double buffer).
    # Uses float floor instead of vector integer division; exact for p <= 512.
    ai = jax.lax.broadcasted_iota(jnp.int32, (p, p), 0).astype(jnp.float32)
    aj = jax.lax.broadcasted_iota(jnp.int32, (p, p), 1).astype(jnp.float32)
    inv = jnp.float32(1.0 / d)
    si = jnp.floor((ai + 0.5) * inv)
    sj = jnp.floor((aj + 0.5) * inv)
    m = jnp.where(si == sj, 1.0, 0.0).astype(jnp.bfloat16)

    inv_d = jnp.float32(1.0 / d)

    def seg_mean(v):
        hi = v.astype(jnp.bfloat16)
        lo = (v - hi.astype(jnp.float32)).astype(jnp.bfloat16)
        s = jnp.dot(hi, m, preferred_element_type=jnp.float32)
        s = s + jnp.dot(lo, m, preferred_element_type=jnp.float32)
        return s * inv_d

    mu = seg_mean(x)                                     # per-lane segment mean
    xc = x - mu
    var = seg_mean(xc * xc)                              # centered variance
    scale = wb_ref[0] * jax.lax.rsqrt(var + eps)
    o_ref[...] = (xc * scale + wb_ref[1]).astype(o_ref.dtype)


def _layernorm_cols_kernel(wb_ref, x_ref, o_ref, *, eps):
    # Normalized axis is the sublane axis of a (1, d, tile) block. Used when
    # the normalized axis is not last, avoiding a moveaxis HBM round trip.
    x = x_ref[...].astype(jnp.float32)
    mu = jnp.mean(x, axis=1, keepdims=True)
    xc = x - mu
    var = jnp.mean(xc * xc, axis=1, keepdims=True)
    scale = wb_ref[0] * jax.lax.rsqrt(var + eps)
    o_ref[...] = (xc * scale + wb_ref[1]).astype(o_ref.dtype)


# ----------------------------- wrappers --------------------------------------

_COMPILER_PARAMS_1D = pltpu.CompilerParams(
    dimension_semantics=("parallel",), vmem_limit_bytes=_VMEM_LIMIT_BYTES)
_COMPILER_PARAMS_2D = pltpu.CompilerParams(
    dimension_semantics=("parallel", "parallel"), vmem_limit_bytes=_VMEM_LIMIT_BYTES)


def _pick_block_rows(n_rows, row_bytes, requested=None):
    if requested is not None:
        # sanitize caller value: multiple of 8, capped at n_rows (full dim OK)
        return min(_round_up(max(int(requested), 1), 8), n_rows)
    # VMEM tile budget cap
    cap = max(8, (_TARGET_TILE_BYTES // max(int(row_bytes), 1)) // 8 * 8)
    # aim for >= _MIN_GRID_STEPS steps so v7x can shard rows over both TCs
    want = max(8, _round_up(-(-n_rows // _MIN_GRID_STEPS), 8))
    br = min(cap, want)
    return n_rows if br >= n_rows else br


def _call_rows(x2d, wb, eps, block_rows=None):
    n_rows, d = x2d.shape
    br = _pick_block_rows(n_rows, d * x2d.dtype.itemsize, block_rows)
    kernel = functools.partial(_layernorm_rows_kernel, eps=float(eps))
    return pl.pallas_call(
        kernel,
        out_shape=jax.ShapeDtypeStruct((n_rows, d), x2d.dtype),
        grid=(pl.cdiv(n_rows, br),),                    # ragged last block is fine
        in_specs=[pl.BlockSpec(memory_space=pltpu.SMEM),        # [w, b]
                  pl.BlockSpec((br, d), lambda i: (i, 0))],
        out_specs=pl.BlockSpec((br, d), lambda i: (i, 0)),
        compiler_params=_COMPILER_PARAMS_1D,
    )(wb, x2d)


def _call_packed(xp, wb, d, p, eps, block_rows=None):
    n_rows = xp.shape[0]
    br = _pick_block_rows(n_rows, p * xp.dtype.itemsize, block_rows)
    kernel = functools.partial(_layernorm_packed_kernel, d=d, p=p, eps=float(eps))
    return pl.pallas_call(
        kernel,
        out_shape=jax.ShapeDtypeStruct((n_rows, p), xp.dtype),
        grid=(pl.cdiv(n_rows, br),),
        in_specs=[pl.BlockSpec(memory_space=pltpu.SMEM),        # [w, b]
                  pl.BlockSpec((br, p), lambda i: (i, 0))],
        out_specs=pl.BlockSpec((br, p), lambda i: (i, 0)),
        compiler_params=_COMPILER_PARAMS_1D,
    )(wb, xp)


def _call_cols(x3d, wb, eps):
    lead, d, tail = x3d.shape
    itemsize = x3d.dtype.itemsize
    if tail <= _LANES:
        tb = tail                                       # block lane dim == full dim
    else:
        budget = max(_LANES,
                     (_TARGET_TILE_BYTES // max(d * itemsize, 1)) // _LANES * _LANES)
        tb = tail if budget >= tail else budget         # multiple of 128 otherwise
    kernel = functools.partial(_layernorm_cols_kernel, eps=float(eps))
    return pl.pallas_call(
        kernel,
        out_shape=jax.ShapeDtypeStruct((lead, d, tail), x3d.dtype),
        grid=(lead, pl.cdiv(tail, tb)),
        in_specs=[pl.BlockSpec(memory_space=pltpu.SMEM),        # [w, b]
                  pl.BlockSpec((1, d, tb), lambda i, j: (i, 0, j))],
        out_specs=pl.BlockSpec((1, d, tb), lambda i, j: (i, 0, j)),
        compiler_params=_COMPILER_PARAMS_2D,
    )(wb, x3d)


def _pack_lanes(d):
    """Super-row width P = lcm(d, 128) if packing helps and fits, else None."""
    if d % _LANES == 0:
        return None                     # row path is already lane-dense
    p = math.lcm(d, _LANES)
    return p if p <= _MAX_PACK_LANES else None
    # TODO(synk): d with lcm(d,128) > 512 (e.g. d=80) stays on the masked row
    # path; packing there would make the MXU segmented sums the bottleneck.


def layernorm_pallas(x, w, b, d, eps=1e-5, block_rows=None):
    # --- replicate the PyTorch axis search: last axis whose size == d ---
    axis = None
    for i in range(x.ndim - 1, -1, -1):
        if x.shape[i] == d:
            axis = i
            break
    assert axis is not None, f"no axis of size {d} in shape {x.shape}"

    wb = jnp.stack([jnp.asarray(w, jnp.float32), jnp.asarray(b, jnp.float32)])

    if axis != x.ndim - 1:
        # Normalized axis is not last: free contiguous reshape to (lead, d, tail)
        # and reduce over the sublane axis in-kernel (no moveaxis HBM pass).
        lead = math.prod(x.shape[:axis])
        tail = math.prod(x.shape[axis + 1:])
        out = _call_cols(x.reshape(lead, d, tail), wb, eps)
        return out.reshape(x.shape)

    rows = math.prod(x.shape[:-1])
    if rows == 0:
        return x
    x2d = x.reshape(rows, d)

    p = _pack_lanes(d)
    if p is None or rows < (p // d):
        out2d = _call_rows(x2d, wb, eps, block_rows)
        return out2d.reshape(x.shape)

    g = p // d
    rows_main = (rows // g) * g
    xp = x2d[:rows_main].reshape(rows_main // g, p)     # free contiguous view of bulk
    main = _call_packed(xp, wb, d, p, eps, block_rows).reshape(rows_main, d)
    if rows_main == rows:
        return main.reshape(x.shape)
    # < g leftover rows: one tiny masked-row call instead of dropping the whole
    # tensor onto the masked path.
    tail_out = _call_rows(x2d[rows_main:], wb, eps)
    return jnp.concatenate([main, tail_out], axis=0).reshape(x.shape)


def layernorm_ref(x, w, b, d, eps=1e-5):
    # Faithful to the PyTorch module (one-pass formula, f32).
    axis = None
    for i in range(x.ndim - 1, -1, -1):
        if x.shape[i] == d:
            axis = i
            break
    xf = x.astype(jnp.float32)
    mu = jnp.mean(xf, axis=axis, keepdims=True)
    mu2 = jnp.mean(xf * xf, axis=axis, keepdims=True)
    sigma = jnp.sqrt(mu2 - mu * mu + eps)
    return (w * (xf - mu) / sigma + b).astype(x.dtype)


if __name__ == "__main__":
    key = jax.random.PRNGKey(0)
    k1, k2, k3, k4, k5, k6 = jax.random.split(key, 6)

    # parameters as in the PyTorch __init__ (scalar w, scalar b), perturbed so
    # the affine path is actually exercised
    w = jnp.float32(1.0) + 0.5
    b = jnp.float32(0.0) + 0.25

    def check(name, x, d, **kw):
        out = jax.block_until_ready(layernorm_pallas(x, w, b, d, **kw))
        ref = layernorm_ref(x, w, b, d)
        assert out.shape == x.shape and out.dtype == x.dtype, name
        assert jnp.allclose(out, ref, atol=1e-4, rtol=1e-4), f"mismatch: {name}"

    # primary case (module shapes): batch=2, seq=8, hidden=32
    # d=32 divides 128 -> lane-dense packed path (P=128), grid=(1,)
    check("packed d=32", jax.random.normal(k1, (2, 8, 32), jnp.float32), 32)

    # multi-step ragged packed grid (12 super-rows -> 2 grid steps, last ragged)
    check("packed ragged grid", jax.random.normal(k2, (48, 32), jnp.float32), 32)

    # d=48 does not divide 128: generalized packing P=lcm(48,128)=384, and
    # rows % g != 0 -> packed bulk + tiny row-path tail call
    check("packed d=48 + tail",
          jax.random.normal(k3, (3, 6, 48), jnp.float32) + 0.5, 48)

    # d multiple of 128: plain lane-dense row path, >= 4 grid steps
    check("rows d=256", jax.random.normal(k4, (4, 16, 256), jnp.float32), 256)

    # normalized axis is not the last axis -> sublane-reduction kernel
    check("cols small tail", jax.random.normal(k5, (2, 32, 24), jnp.float32), 32)
    check("cols wide tail", jax.random.normal(k6, (2, 32, 160), jnp.float32), 32)

    print("KERNEL_OK")
</pallas_src>

<mosaic_0001>
module attributes {stable_mosaic.version = 11 : i64} {
  func.func @_layernorm_packed_kernel(%arg0: i32, %arg1: memref<2xf32, #tpu.memory_space<smem>>, %arg2: memref<4x128xf32, #tpu.memory_space<vmem>>, %arg3: memref<4x128xf32, #tpu.memory_space<vmem>>) attributes {dimension_semantics = [#tpu.dimension_semantics<parallel>], iteration_bounds = array<i64: 1>, scalar_prefetch = 0 : i64, scratch_operands = 0 : i64, tpu.core_type = #tpu.core_type<tc>, window_params = [{transform_indices = @transform_0, window_bounds = array<i64: 2>}, {transform_indices = @transform_1, window_bounds = array<i64: 4, 128>}, {transform_indices = @transform_2, window_bounds = array<i64: 4, 128>}]} {
    %c0 = arith.constant 0 : index
    %c0_0 = arith.constant 0 : index
    %0 = vector.load %arg2[%c0, %c0_0] : memref<4x128xf32, #tpu.memory_space<vmem>>, vector<4x128xf32>
    %1 = tpu.iota {dimensions = array<i32: 0>} : vector<128x128xi32>
    %2 = arith.sitofp %1 : vector<128x128xi32> to vector<128x128xf32>
    %3 = tpu.iota {dimensions = array<i32: 1>} : vector<128x128xi32>
    %4 = arith.sitofp %3 : vector<128x128xi32> to vector<128x128xf32>
    %cst = arith.constant 5.000000e-01 : f32
    %5 = vector.broadcast %cst : f32 to vector<128x128xf32>
    %6 = arith.addf %2, %5 : vector<128x128xf32>
    %cst_1 = arith.constant 3.125000e-02 : f32
    %7 = vector.broadcast %cst_1 : f32 to vector<128x128xf32>
    %8 = arith.mulf %6, %7 : vector<128x128xf32>
    %9 = math.floor %8 : vector<128x128xf32>
    %cst_2 = arith.constant 5.000000e-01 : f32
    %10 = vector.broadcast %cst_2 : f32 to vector<128x128xf32>
    %11 = arith.addf %4, %10 : vector<128x128xf32>
    %cst_3 = arith.constant 3.125000e-02 : f32
    %12 = vector.broadcast %cst_3 : f32 to vector<128x128xf32>
    %13 = arith.mulf %11, %12 : vector<128x128xf32>
    %14 = math.floor %13 : vector<128x128xf32>
    %15 = arith.cmpf oeq, %9, %14 : vector<128x128xf32>
    %cst_4 = arith.constant 1.000000e+00 : f32
    %cst_5 = arith.constant 0.000000e+00 : f32
    %16 = vector.broadcast %cst_4 : f32 to vector<128x128xf32>
    %17 = vector.broadcast %cst_5 : f32 to vector<128x128xf32>
    %18 = arith.select %15, %16, %17 : vector<128x128xi1>, vector<128x128xf32>
    %19 = arith.truncf %18 : vector<128x128xf32> to vector<128x128xbf16>
    %20 = arith.truncf %0 : vector<4x128xf32> to vector<4x128xbf16>
    %21 = arith.extf %20 : vector<4x128xbf16> to vector<4x128xf32>
    %22 = arith.subf %0, %21 : vector<4x128xf32>
    %23 = arith.truncf %22 : vector<4x128xf32> to vector<4x128xbf16>
    %cst_6 = arith.constant dense<0.000000e+00> : vector<4x128xf32>
    %24 = tpu.matmul %20, %19, %cst_6 {dimension_numbers = #tpu.dot_dimension_numbers<[1], [0], [0], [1], [0, 0, 1, 1], [], []>} : vector<4x128xbf16>, vector<128x128xbf16>, vector<4x128xf32> -> vector<4x128xf32>
    %cst_7 = arith.constant dense<0.000000e+00> : vector<4x128xf32>
    %25 = tpu.matmul %23, %19, %cst_7 {dimension_numbers = #tpu.dot_dimension_numbers<[1], [0], [0], [1], [0, 0, 1, 1], [], []>} : vector<4x128xbf16>, vector<128x128xbf16>, vector<4x128xf32> -> vector<4x128xf32>
    %26 = arith.addf %24, %25 : vector<4x128xf32>
    %cst_8 = arith.constant 3.125000e-02 : f32
    %27 = vector.broadcast %cst_8 : f32 to vector<4x128xf32>
    %28 = arith.mulf %26, %27 : vector<4x128xf32>
    %29 = arith.subf %0, %28 : vector<4x128xf32>
    %30 = arith.mulf %29, %29 : vector<4x128xf32>
    %31 = arith.truncf %30 : vector<4x128xf32> to vector<4x128xbf16>
    %32 = arith.extf %31 : vector<4x128xbf16> to vector<4x128xf32>
    %33 = arith.subf %30, %32 : vector<4x128xf32>
    %34 = arith.truncf %33 : vector<4x128xf32> to vector<4x128xbf16>
    %cst_9 = arith.constant dense<0.000000e+00> : vector<4x128xf32>
    %35 = tpu.matmul %31, %19, %cst_9 {dimension_numbers = #tpu.dot_dimension_numbers<[1], [0], [0], [1], [0, 0, 1, 1], [], []>} : vector<4x128xbf16>, vector<128x128xbf16>, vector<4x128xf32> -> vector<4x128xf32>
    %cst_10 = arith.constant dense<0.000000e+00> : vector<4x128xf32>
    %36 = tpu.matmul %34, %19, %cst_10 {dimension_numbers = #tpu.dot_dimension_numbers<[1], [0], [0], [1], [0, 0, 1, 1], [], []>} : vector<4x128xbf16>, vector<128x128xbf16>, vector<4x128xf32> -> vector<4x128xf32>
    %37 = arith.addf %35, %36 : vector<4x128xf32>
    %cst_11 = arith.constant 3.125000e-02 : f32
    %38 = vector.broadcast %cst_11 : f32 to vector<4x128xf32>
    %39 = arith.mulf %37, %38 : vector<4x128xf32>
    %c0_12 = arith.constant 0 : index
    %40 = memref.load %arg1[%c0_12] : memref<2xf32, #tpu.memory_space<smem>>
    %cst_13 = arith.constant 9.99999974E-6 : f32
    %41 = vector.broadcast %cst_13 : f32 to vector<4x128xf32>
    %42 = arith.addf %39, %41 : vector<4x128xf32>
    %43 = math.rsqrt %42 : vector<4x128xf32>
    %44 = vector.broadcast %40 : f32 to vector<4x128xf32>
    %45 = arith.mulf %44, %43 : vector<4x128xf32>
    %46 = arith.mulf %29, %45 : vector<4x128xf32>
    %c1 = arith.constant 1 : index
    %47 = memref.load %arg1[%c1] : memref<2xf32, #tpu.memory_space<smem>>
    %48 = vector.broadcast %47 : f32 to vector<4x128xf32>
    %49 = arith.addf %46, %48 : vector<4x128xf32>
    %c0_14 = arith.constant 0 : index
    %c0_15 = arith.constant 0 : index
    %50 = vector.load %arg3[%c0_14, %c0_15] : memref<4x128xf32, #tpu.memory_space<vmem>>, vector<4x128xf32>
    tpu.vector_store %arg3[%c0_14, %c0_15], %49 {strides = array<i32>} : memref<4x128xf32, #tpu.memory_space<vmem>>, vector<4x128xf32>,
    return
  }
  func.func @transform_0(%arg0: i32) -> i32 {
    %c0_i32 = arith.constant 0 : i32
    %c0_i32_0 = arith.constant 0 : i32
    return %c0_i32 : i32
  }
  func.func @transform_1(%arg0: i32) -> (i32, i32) {
    %c0_i32 = arith.constant 0 : i32
    %c0_i32_0 = arith.constant 0 : i32
    return %arg0, %c0_i32 : i32, i32
  }
  func.func @transform_2(%arg0: i32) -> (i32, i32) {
    %c0_i32 = arith.constant 0 : i32
    %c0_i32_0 = arith.constant 0 : i32
    return %arg0, %c0_i32 : i32, i32
  }
}

</mosaic_0001>

<bundles_post_ra>
// kernel: tpu_custom_call.1
= control target key start
LH: loop header
LB: loop body
LE: loop exit
PB: predicated region body
PF: predicated region fallthrough
CT: control target
= control target key end

     0   :  { %7 = vsyncpa [#allocation5], 0  ;;  %s573_s0 = inlined_call_operand.hbm [shape: f32[2], index: 0, kind: input, shape index: {}]   ;;  %s574_s1 = inlined_call_operand.hbm [shape: f32[4,128], index: 1, kind: input, shape index: {}]   ;;  %s575_s2 = inlined_call_operand.hbm [shape: f32[4,128], index: 2, kind: output, shape index: {}]  }
   0x1   :  { %8 = vsyncpa [#allocation3], 0 }
   0x2   :  { %9 = vsyncpa [#allocation4], 0  ;;  %s15_s11 = sshll.u32 %s573_s0, 4  ;;  %s24_s14 = sshll.u32 %s574_s1, 4  ;;  %s16_s11 = int_to_ptr.hbm [resolvable:$true] %s15_s11  ;;  %s25_s14 = int_to_ptr.hbm [resolvable:$true] %s24_s14 }
   0x3   :  { %s405_s15 = smov [#allocation2]   ;;  %s406_s16 = smov [#allocation6]  }
   0x4   :  { %18 = dma.hbm_to_smem %s16_s11, 16, %s405_s15, [#allocation5]  }
   0x5   :  { %s26_s17 = sshll.u32 %s406_s16, 4  ;;  %s27_s17 = int_to_ptr.vmem [resolvable:$true] %s26_s17 }
   0x6   :  { %29 = dma.hbm_to_vmem [thread:$0]  %s25_s14, 64, %s27_s17, [#allocation3]  }
   0x7   :  { %399 = dma.done.wait [#allocation5], 16  }
   0x8   :  { %400 = vsyncadd [#allocation5], 4294967280 }
   0x9   :  { %401 = dma.done.wait [#allocation3], 64  }
   0xa   :  { %402 = vsyncadd [#allocation3], 4294967232 }
   0xb   :  { %38 = sfence }
   0xc   :  { %v40_v0 = vlaneseq  ;;  %v407_v48 = vmov 1.0|1.0   ;;  %s231_s0 = sld [smem:[#allocation2]]  ;;  %s408_s18 = smov [#allocation7]  }
   0xd   :  { %s332_s1 = sld [smem:[#allocation2 + $0x1]]  ;;  %s255_s19 = sshll.u32 %s408_s18, 4  ;;  %s256_s19 = int_to_ptr.vmem [resolvable:$true] %s255_s19 }
   0xe   :  { %v430_v1 = vshrl.u32 %v40_v0, 7  ;;  %v74_v2 = vand.u32 127, %v40_v0  ;;  %s257_s22 = sshll.u32 %s575_s2, 4  ;;  %s258_s22 = int_to_ptr.hbm [resolvable:$true] %s257_s22 }
  0x10   :  { %v55_v3 = vadd.s32 112, %v430_v1  ;;  %v56_v4 = vadd.s32 120, %v430_v1  ;;  %v75_v5 = vcvt.s32.f32 %v74_v2  ;;  %v53_v6 = vadd.s32 96, %v430_v1 }
  0x11   :  { %v54_v7 = vadd.s32 104, %v430_v1  ;;  %v51_v8 = vadd.s32 80, %v430_v1  ;;  %v52_v9 = vadd.s32 88, %v430_v1  ;;  %v49_v10 = vadd.s32 64, %v430_v1 }
  0x12   :  { %v71_v11 = vcvt.s32.f32 %v55_v3  ;;  %v72_v12 = vcvt.s32.f32 %v56_v4  ;;  %v124_v13 = vadd.f32 0.5, %v75_v5  ;;  %v69_v14 = vcvt.s32.f32 %v53_v6 }
  0x13   :  { %v70_v15 = vcvt.s32.f32 %v54_v7  ;;  %v67_v16 = vcvt.s32.f32 %v51_v8  ;;  %v68_v17 = vcvt.s32.f32 %v52_v9  ;;  %v50_v18 = vadd.s32 72, %v430_v1 }
  0x14   :  { %v90_v19 = vadd.f32 0.5, %v71_v11  ;;  %v91_v20 = vadd.f32 0.5, %v72_v12  ;;  %v125_v21 = vmul.f32 0.03125, %v124_v13  ;;  %v88_v22 = vadd.f32 0.5, %v69_v14 }
  0x15   :  { %v89_v23 = vadd.f32 0.5, %v70_v15  ;;  %v86_v24 = vadd.f32 0.5, %v67_v16  ;;  %v87_v25 = vadd.f32 0.5, %v68_v17  ;;  %v65_v26 = vcvt.s32.f32 %v49_v10 }
  0x16   :  { %v106_v27 = vmul.f32 0.03125, %v90_v19  ;;  %v107_v28 = vmul.f32 0.03125, %v91_v20  ;;  %v440_v29 = vfloor.f32 %v125_v21  ;;  %v104_v30 = vmul.f32 0.03125, %v88_v22 }
  0x17   :  { %v105_v31 = vmul.f32 0.03125, %v89_v23  ;;  %v102_v32 = vmul.f32 0.03125, %v86_v24  ;;  %v103_v33 = vmul.f32 0.03125, %v87_v25  ;;  %v66_v34 = vcvt.s32.f32 %v50_v18  ;;  %v39_v25 = vld [vmem:[#allocation6] sm:$0xf] }
  0x18   :  { %v122_v35 = vfloor.f32 %v106_v27  ;;  %v123_v36 = vfloor.f32 %v107_v28  ;;  %v120_v37 = vfloor.f32 %v104_v30  ;;  %v84_v38 = vadd.f32 0.5, %v65_v26 }
  0x19   :  { %v121_v39 = vfloor.f32 %v105_v31  ;;  %v118_v40 = vfloor.f32 %v102_v32  ;;  %v119_v41 = vfloor.f32 %v103_v33  ;;  %v85_v42 = vadd.f32 0.5, %v66_v34 }
  0x1a   :  { %vm141_vm0 = vcmp.eq.f32.partialorder %v122_v35, %v440_v29  ;;  %vm142_vm1 = vcmp.eq.f32.partialorder %v123_v36, %v440_v29  ;;  %vm139_vm2 = vcmp.eq.f32.partialorder %v120_v37, %v440_v29  ;;  %v100_v43 = vmul.f32 0.03125, %v84_v38 }
  0x1b   :  { %vm445_vm3 = vmpackc.low %vm142_vm1, %vm141_vm0  ;;  %vm140_vm4 = vcmp.eq.f32.partialorder %v121_v39, %v440_v29  ;;  %vm451_vm5 = vcmp.eq.f32.partialorder %v118_v40, %v440_v29  ;;  %vm456_vm6 = vcmp.eq.f32.partialorder %v119_v41, %v440_v29  ;;  %v101_v47 = vmul.f32 0.03125, %v85_v42 }
  0x1c   :  { %269 = vmatpush.bf16.msk.msra.mxu0 %vm445_vm3, %v407_v48  ;;  %285 = vmatpush.bf16.msk.msra.mxu1 %vm445_vm3, %v407_v48  ;;  %v116_v49 = vfloor.f32 %v100_v43  ;;  %v47_v50 = vadd.s32 48, %v430_v1  ;;  %v48_v51 = vadd.s32 56, %v430_v1  ;;  %v45_v52 = vadd.s32 32, %v430_v1  ;;  %vm469_vm7 = vmpackc.low %vm140_vm4, %vm139_vm2 }
  0x1d   :  { %v117_v54 = vfloor.f32 %v101_v47  ;;  %v46_v55 = vadd.s32 40, %v430_v1  ;;  %v43_v56 = vadd.s32 16, %v430_v1  ;;  %v44_v57 = vadd.s32 24, %v430_v1  ;;  %317 = vmatpush.bf16.msk.msra.mxu3 %vm445_vm3, %v407_v48  ;;  %301 = vmatpush.bf16.msk.msra.mxu2 %vm445_vm3, %v407_v48  ;;  %vm503_vm10 = vmpackc.low %vm456_vm6, %vm451_vm5 }
  0x1e   :  { %vm483_vm8 = vcmp.eq.f32.partialorder %v116_v49, %v440_v29  ;;  %v63_v59 = vcvt.s32.f32 %v47_v50  ;;  %v64_v60 = vcvt.s32.f32 %v48_v51  ;;  %v61_v61 = vcvt.s32.f32 %v45_v52 }
  0x1f   :  { %vm488_vm9 = vcmp.eq.f32.partialorder %v117_v54, %v440_v29  ;;  %v62_v63 = vcvt.s32.f32 %v46_v55  ;;  %v59_v0 = vcvt.s32.f32 %v43_v56  ;;  %v60_v2 = vcvt.s32.f32 %v44_v57 }
  0x20   :  { %271 = vmatpush.bf16.msk.msra.mxu0 %vm469_vm7, %v407_v48  ;;  %287 = vmatpush.bf16.msk.msra.mxu1 %vm469_vm7, %v407_v48  ;;  %v82_v3 = vadd.f32 0.5, %v63_v59  ;;  %v83_v4 = vadd.f32 0.5, %v64_v60  ;;  %v80_v5 = vadd.f32 0.5, %v61_v61  ;;  %v42_v6 = vadd.s32 8, %v430_v1  ;;  %vm524_vm11 = vmpackc.low %vm488_vm9, %vm483_vm8 }
  0x21   :  { %v81_v8 = vadd.f32 0.5, %v62_v63  ;;  %v78_v9 = vadd.f32 0.5, %v59_v0  ;;  %v79_v10 = vadd.f32 0.5, %v60_v2  ;;  %v57_v11 = vcvt.s32.f32 %v430_v1  ;;  %319 = vmatpush.bf16.msk.msra.mxu3 %vm469_vm7, %v407_v48  ;;  %303 = vmatpush.bf16.msk.msra.mxu2 %vm469_vm7, %v407_v48 }
  0x22   :  { %v98_v12 = vmul.f32 0.03125, %v82_v3  ;;  %v99_v13 = vmul.f32 0.03125, %v83_v4  ;;  %v96_v14 = vmul.f32 0.03125, %v80_v5  ;;  %v58_v15 = vcvt.s32.f32 %v42_v6 }
  0x23   :  { %v97_v16 = vmul.f32 0.03125, %v81_v8  ;;  %v94_v20 = vmul.f32 0.03125, %v78_v9  ;;  %v95_v21 = vmul.f32 0.03125, %v79_v10  ;;  %v76_v22 = vadd.f32 0.5, %v57_v11 }
  0x24   :  { %273 = vmatpush.bf16.msk.msra.mxu0 %vm503_vm10, %v407_v48  ;;  %289 = vmatpush.bf16.msk.msra.mxu1 %vm503_vm10, %v407_v48  ;;  %v114_v1 = vfloor.f32 %v98_v12  ;;  %v115_v17 = vfloor.f32 %v99_v13  ;;  %v112_v19 = vfloor.f32 %v96_v14  ;;  %v77_v24 = vadd.f32 0.5, %v58_v15 }
  0x25   :  { %321 = vmatpush.bf16.msk.msra.mxu3 %vm503_vm10, %v407_v48  ;;  %305 = vmatpush.bf16.msk.msra.mxu2 %vm503_vm10, %v407_v48  ;;  %v113_v23 = vfloor.f32 %v97_v16  ;;  %v110_v26 = vfloor.f32 %v94_v20  ;;  %v111_v27 = vfloor.f32 %v95_v21  ;;  %v92_v28 = vmul.f32 0.03125, %v76_v22 }
  0x26   :  { %vm133_vm12 = vcmp.eq.f32.partialorder %v114_v1, %v440_v29  ;;  %vm134_vm13 = vcmp.eq.f32.partialorder %v115_v17, %v440_v29  ;;  %vm131_vm15 = vcmp.eq.f32.partialorder %v112_v19, %v440_v29  ;;  %v93_v30 = vmul.f32 0.03125, %v77_v24 }
  0x27   :  { %vm276_vm14 = vmpackc.low %vm134_vm13, %vm133_vm12  ;;  %vm132_vm0 = vcmp.eq.f32.partialorder %v113_v23, %v440_v29  ;;  %v167_v31 = vpack.c.bf16 %v39_v25, %v39_v25  ;;  %vm129_vm2 = vcmp.eq.f32.partialorder %v110_v26, %v440_v29  ;;  %vm130_vm3 = vcmp.eq.f32.partialorder %v111_v27, %v440_v29 }
  0x28   :  { %275 = vmatpush.bf16.msk.msra.mxu0 %vm524_vm11, %v407_v48  ;;  %291 = vmatpush.bf16.msk.msra.mxu1 %vm524_vm11, %v407_v48  ;;  %vm278_vm1 = vmpackc.low %vm132_vm0, %vm131_vm15  ;;  %v108_v32 = vfloor.f32 %v92_v28  ;;  %v109_v33 = vfloor.f32 %v93_v30  ;;  %v243_v61 = vstv %s231_s0  ;;  %v247_v0 = vstv %s332_s1 }
  0x29   :  { %323 = vmatpush.bf16.msk.msra.mxu3 %vm524_vm11, %v407_v48  ;;  %307 = vmatpush.bf16.msk.msra.mxu2 %vm524_vm11, %v407_v48  ;;  %v168_v34 = vunpack.c.l.bf16 %v167_v31  ;;  %vm280_vm4 = vmpackc.low %vm130_vm3, %vm129_vm2 }
  0x2a   :  { %vm127_vm5 = vcmp.eq.f32.partialorder %v108_v32, %v440_v29  ;;  %vm128_vm6 = vcmp.eq.f32.partialorder %v109_v33, %v440_v29 }
  0x2b   :  { %v169_v35 = vsub.f32 %v39_v25, %v168_v34  ;;  %vm282_vm7 = vmpackc.low %vm128_vm6, %vm127_vm5 }
  0x2c   :  { %277 = vmatpush.bf16.msk.msra.mxu0 %vm276_vm14, %v407_v48  ;;  %293 = vmatpush.bf16.msk.msra.mxu1 %vm276_vm14, %v407_v48 }
  0x2d   :  { %325 = vmatpush.bf16.msk.msra.mxu3 %vm276_vm14, %v407_v48  ;;  %309 = vmatpush.bf16.msk.msra.mxu2 %vm276_vm14, %v407_v48  ;;  %v170_v36 = vpack.c.bf16 %v169_v35, %v169_v35 }
  0x30   :  { %279 = vmatpush.bf16.msk.msra.mxu0 %vm278_vm1, %v407_v48  ;;  %295 = vmatpush.bf16.msk.msra.mxu1 %vm278_vm1, %v407_v48 }
  0x31   :  { %327 = vmatpush.bf16.msk.msra.mxu3 %vm278_vm1, %v407_v48  ;;  %311 = vmatpush.bf16.msk.msra.mxu2 %vm278_vm1, %v407_v48 }
  0x34   :  { %281 = vmatpush.bf16.msk.msra.mxu0 %vm280_vm4, %v407_v48  ;;  %297 = vmatpush.bf16.msk.msra.mxu1 %vm280_vm4, %v407_v48 }
  0x35   :  { %329 = vmatpush.bf16.msk.msra.mxu3 %vm280_vm4, %v407_v48  ;;  %313 = vmatpush.bf16.msk.msra.mxu2 %vm280_vm4, %v407_v48 }
  0x38   :  { %283 = vmatpush.bf16.msk.msra.mxu0 %vm282_vm7, %v407_v48  ;;  %299 = vmatpush.bf16.msk.msra.mxu1 %vm282_vm7, %v407_v48 }
  0x39   :  { %331 = vmatpush.bf16.msk.msra.mxu3 %vm282_vm7, %v407_v48  ;;  %315 = vmatpush.bf16.msk.msra.mxu2 %vm282_vm7, %v407_v48 }
  0x3b   :  { %179 = vmatmul.bf16.vlgmr.msra.gmra.mxu0 %v170_v36  ;;  %192 = vmatmul.bf16.vlgmr.msra.gmra.mxu1 %v167_v31 }
  0xb8   :  { %v180_v29 = vpop.f32.mrf.mxu0  ;;  %v193_v37 = vpop.f32.mrf.mxu1 }
  0xb9   :  { %v194_v38 = vadd.f32 %v193_v37, %v180_v29 }
  0xbb   :  { %v197_v39 = vmul.f32 0.03125, %v194_v38 }
  0xbd   :  { %v198_v40 = vsub.f32 %v39_v25, %v197_v39 }
  0xbf   :  { %v199_v41 = vmul.f32 %v198_v40, %v198_v40 }
  0xc0   :  { %v182_v42 = vpop.f32.mrf.mxu0  ;;  %v195_v43 = vpop.f32.mrf.mxu1 }
  0xc1   :  { %v200_v44 = vpack.c.bf16 %v199_v41, %v199_v41 }
  0xc3   :  { %v201_v45 = vunpack.c.l.bf16 %v200_v44  ;;  %225 = vmatmul.bf16.vlgmr.msra.gmra.mxu3 %v200_v44 }
  0xc5   :  { %v202_v46 = vsub.f32 %v199_v41, %v201_v45 }
  0xc7   :  { %v203_v47 = vpack.c.bf16 %v202_v46, %v202_v46 }
  0xc9   :  { %212 = vmatmul.bf16.vlgmr.msra.gmra.mxu2 %v203_v47 }
 0x146   :  { %v226_v49 = vpop.f32.mrf.mxu3 }
 0x14c   :  { %v213_v50 = vpop.f32.mrf.mxu2 }
 0x14d   :  { %v227_v51 = vadd.f32 %v226_v49, %v213_v50 }
 0x14e   :  { %v228_v48 = vpop.f32.mrf.mxu3 }
 0x14f   :  { %v230_v52 = vmul.f32 0.03125, %v227_v51 }
 0x151   :  { %v232_v53 = vadd.f32 1e-05, %v230_v52 }
 0x153   :  { %337 = vrsqrt.f32 %v232_v53  ;;  %vm239_vm9 = vweird.f32 %v232_v53 }
 0x154   :  { %v215_v54 = vpop.f32.mrf.mxu2 }
 0x159   :  { %v338_v55 = vpop.eup %337 }
 0x15a   :  { %v234_v56 = vmul.f32 %v338_v55, %v232_v53  ;;  %vm240_vm8 = vweird.f32 %v338_v55 }
 0x15b   :  { %vm241_vm10 = vmor %vm239_vm9, %vm240_vm8 }
 0x15c   :  { %v235_v57 = vmul.f32 %v338_v55, %v234_v56 }
 0x15e   :  { %v236_v58 = vmul.f32 0.5, %v235_v57 }
 0x160   :  { %v237_v59 = vsub.f32 1.5, %v236_v58 }
 0x162   :  { %v238_v60 = vmul.f32 %v338_v55, %v237_v59 }
 0x164   :  { %v242_v62 = vsel %vm241_vm10, %v338_v55, %v238_v60 }
 0x165   :  { %v244_v63 = vmul.f32 %v243_v61, %v242_v62 }
 0x167   :  { %v245_v2 = vmul.f32 %v244_v63, %v198_v40 }
 0x169   :  { %v248_v3 = vadd.f32 %v247_v0, %v245_v2 }
 0x16b   :  { %249 = vst [vmem:[#allocation7] sm:$0xf] %v248_v3 }
 0x16c   :  { %260 = dma.vmem_to_hbm [thread:$0]  %s256_s19, 64, %s258_s22, [#allocation4]  }
 0x16d   :  { %403 = dma.done.wait [#allocation4], 64  }
 0x16e   :  { %404 = vsyncadd [#allocation4], 4294967232 }
 0x16f   :  { %265 = vsyncpa [#allocation3], 1 }
 0x170   :  { %266 = vsyncpa [#allocation4], 1 }
 0x171   :  { %267 = vsyncpa [#allocation5], 1 }

</bundles_post_ra>
